<compile_context>
chip_gen: v7x
topology: tpu7x:2x2x1
jax: 0.10.0
libtpu: 0.0.40
codegen_flags: <defaults>
</compile_context>

<pallas_src>
import jax
import jax.numpy as jnp
from jax import lax
from jax.experimental import pallas as pl
from jax.experimental.pallas import tpu as pltpu

GAMMA = 2.0    # hard-coded as explicit squares in the kernel
ALPHA = 0.25
SMOOTH = 1.0
WEIGHT = 20.0
IOU_SCALE = 1.0

_LANE = 128
_DEFAULT_BLOCK_ROWS = 8192            # (8192,128) f32 = 4 MiB / input / buffer
_SUB_ROWS = 512                       # in-kernel chunk: bounds live f32 temps to ~2-3 MiB
_SMALL_ROWS = 512                     # below this, a single full-extent block is fine
_MIN_BLOCKS = 4                       # target grid length for pipelining / 2 TCs on v7x
_VMEM_LIMIT_BYTES = 32 * 1024 * 1024  # safe on v5e/v6e (128 MiB phys) and v7x (64 MiB)

# TODO(synk): sweep pltpu.CORE_PARALLEL here on v7x (2 TCs/chip); "parallel" is
# the portable default used for v5e/v6e.
_DIM_SEMANTICS = ("parallel",)


def _sublane_granularity(dtype) -> int:
    """Sublane packing granularity: 8 for f32, 16 for bf16, 32 for int8."""
    itemsize = jnp.dtype(dtype).itemsize
    return 8 * max(1, 4 // itemsize)


def _choose_eff_rows(rows, gran, block_rows, small_rows=_SMALL_ROWS,
                     min_blocks=_MIN_BLOCKS):
    """Pick the per-grid-step block row count.

    Small inputs: one full-extent block (per-step overhead dominates).
    Larger inputs: at least `min_blocks` blocks so the DMA/compute pipeline has
    work and both v7x TensorCores get blocks, capped at `block_rows` to bound
    VMEM, and rounded to the sublane granularity so tiling stays legal.
    """
    if rows <= small_rows:
        return rows
    cap = max(gran, (block_rows // gran) * gran)
    target = max(min_blocks, -(-rows // cap))
    eff = (rows // target) // gran * gran
    return max(gran, min(eff, cap))


def _make_sums_kernel(eff_rows, sub_rows, n_blocks, tail_valid, need_mask):
    """Per-block partial-sum kernel. All arguments are static Python values."""
    n_sub, rem_rows = divmod(eff_rows, sub_rows)

    def _contribs(x, m, valid):
        # Numerically stable sigmoid / softplus: no overflow for any finite x.
        a = jnp.abs(x)
        e = jnp.exp(-a)                      # in (0, 1]
        l = jnp.log1p(e)                     # log(1 + exp(-|x|))
        sp_pos = jnp.maximum(x, 0.0) + l     # softplus(x)  = -log(1 - p)
        sp_neg = jnp.maximum(-x, 0.0) + l    # softplus(-x) = -log(p)
        inv_t = pl.reciprocal(1.0 + e, approx=True)   # EUP slot, ~2^-12 rel err
        p_big = inv_t                        # sigmoid(|x|)
        p_sml = e * inv_t                    # sigmoid(-|x|)
        pos = x >= 0.0
        p = jnp.where(pos, p_big, p_sml)     # sigmoid(x)
        omp = jnp.where(pos, p_sml, p_big)   # 1 - sigmoid(x)

        # FocalLoss elementwise terms (gamma = 2 -> explicit squares), signs
        # folded so both terms are positive products:
        #   -alpha*m*(1-p)^2*log(p)       =  alpha*m*(1-p)^2 * softplus(-x)
        #   -(1-alpha)*(1-m)*p^2*log(1-p) = (1-alpha)*(1-m)*p^2 * softplus(x)
        c_f = (ALPHA * m) * (omp * omp) * sp_neg \
            + ((1.0 - ALPHA) * (1.0 - m)) * (p * p) * sp_pos
        c_p = p
        c_m = m
        c_pm = p * m

        if valid is not None:
            # Ragged tail of the last block: out-of-bounds / pad elements
            # (possibly garbage, even NaN) contribute exactly 0.
            c_p = jnp.where(valid, c_p, 0.0)
            c_m = jnp.where(valid, c_m, 0.0)
            c_pm = jnp.where(valid, c_pm, 0.0)
            c_f = jnp.where(valid, c_f, 0.0)
        return c_p, c_m, c_pm, c_f

    def _fold8(c):
        """(n,128) f32 -> (8,128) partial fold (pure elementwise vadds)."""
        n = c.shape[0]
        if n % 8 == 0:
            if n == 8:
                return c
            return jnp.sum(c.reshape(n // 8, 8, _LANE), axis=0)
        # Only tiny full-extent blocks (n < 8 or odd) reach here: one
        # cross-sublane sum, parked in row 0 of an (8,128) tile.
        s = jnp.sum(c, axis=0, keepdims=True)                    # (1,128)
        row = lax.broadcasted_iota(jnp.int32, (8, _LANE), 0)
        return jnp.where(row == 0, jnp.broadcast_to(s, (8, _LANE)), 0.0)

    def _block_sums(pred_ref, mask_ref, masked):
        zeros8 = jnp.zeros((8, _LANE), jnp.float32)

        def chunk(start, nrows, carry, elem_base):
            x = pred_ref[pl.ds(start, nrows), :].astype(jnp.float32)
            m = mask_ref[pl.ds(start, nrows), :].astype(jnp.float32)
            valid = None
            if masked:
                r = lax.broadcasted_iota(jnp.int32, (nrows, _LANE), 0)
                c = lax.broadcasted_iota(jnp.int32, (nrows, _LANE), 1)
                valid = (elem_base + r * _LANE + c) < tail_valid  # static bound
            cp, cm, cpm, cf = _contribs(x, m, valid)
            ap, am_, apm, af = carry
            return (ap + _fold8(cp), am_ + _fold8(cm),
                    apm + _fold8(cpm), af + _fold8(cf))

        carry = (zeros8, zeros8, zeros8, zeros8)
        if n_sub > 0:
            def body(s, carry):
                off = s * sub_rows
                start = pl.multiple_of(off, sub_rows) if sub_rows % 8 == 0 else off
                return chunk(start, sub_rows, carry, off * _LANE)
            carry = lax.fori_loop(0, n_sub, body, carry)
        if rem_rows > 0:
            start = n_sub * sub_rows
            carry = chunk(start, rem_rows, carry, start * _LANE)
        return carry

    def kernel(pred_ref, mask_ref, out_ref):
        def write(masked):
            ap, am_, apm, af = _block_sums(pred_ref, mask_ref, masked)
            # Four full (8,128) unmasked tile stores.
            out_ref[0, 0] = ap
            out_ref[0, 1] = am_
            out_ref[0, 2] = apm
            out_ref[0, 3] = af

        if not need_mask:
            write(False)
        else:
            last = pl.program_id(0) == n_blocks - 1

            @pl.when(jnp.logical_not(last))
            def _():
                write(False)

            @pl.when(last)
            def _():
                write(True)

    return kernel


def _reduce_sums(pred, mask, block_rows=_DEFAULT_BLOCK_ROWS,
                 sub_rows=_SUB_ROWS, small_rows=_SMALL_ROWS):
    """Pallas reduction: returns ([sum_p, sum_m, sum_pm, sum_focal], numel)."""
    numel = pred.size
    if mask.dtype == jnp.bool_:
        mask = mask.astype(jnp.int8)       # keep HBM traffic at 1 B/elem
    flat_p = pred.reshape(-1)              # native dtype, no upcast copy in HBM
    flat_m = mask.reshape(-1)

    # Common case (numel % 128 == 0): reshape is free, no pad copy. Rare
    # fallback pads only to the next multiple of 128; pad elements are excluded
    # by the in-kernel validity mask.
    rem = numel % _LANE
    if rem:
        pad = _LANE - rem
        flat_p = jnp.pad(flat_p, (0, pad))
        flat_m = jnp.pad(flat_m, (0, pad))
    rows = flat_p.size // _LANE
    P = flat_p.reshape(rows, _LANE)
    M = flat_m.reshape(rows, _LANE)

    gran = max(_sublane_granularity(P.dtype), _sublane_granularity(M.dtype))
    eff_rows = _choose_eff_rows(rows, gran, block_rows, small_rows=small_rows)
    n_blocks = -(-rows // eff_rows)
    block_elems = eff_rows * _LANE
    tail_valid = numel - (n_blocks - 1) * block_elems
    need_mask = (n_blocks * block_elems) != numel

    sub = min(sub_rows, eff_rows)
    kernel = _make_sums_kernel(eff_rows, sub, n_blocks, tail_valid, need_mask)

    out_bytes = n_blocks * 4 * 8 * _LANE * 4
    cost = pl.CostEstimate(
        flops=int(25 * numel),
        transcendentals=int(3 * numel),
        bytes_accessed=int(P.size * P.dtype.itemsize
                           + M.size * M.dtype.itemsize + out_bytes))

    partials = pl.pallas_call(
        kernel,
        out_shape=jax.ShapeDtypeStruct((n_blocks, 4, 8, _LANE), jnp.float32),
        grid=(n_blocks,),
        in_specs=[
            pl.BlockSpec((eff_rows, _LANE), lambda i: (i, 0)),
            pl.BlockSpec((eff_rows, _LANE), lambda i: (i, 0)),
        ],
        out_specs=pl.BlockSpec((1, 4, 8, _LANE), lambda i: (i, 0, 0, 0)),
        compiler_params=pltpu.CompilerParams(
            dimension_semantics=_DIM_SEMANTICS,     # no carried state
            vmem_limit_bytes=_VMEM_LIMIT_BYTES,
        ),
        cost_estimate=cost,
    )(P, M)

    # Tiny (n_blocks, 4, 8, 128) -> (4,) combine in plain JAX.
    sums = jnp.sum(partials, axis=(0, 2, 3))
    return sums, numel


def focal_dice_iou_loss(pred, mask, pred_iou, weight=WEIGHT, iou_scale=IOU_SCALE,
                        block_rows=_DEFAULT_BLOCK_ROWS, small_rows=_SMALL_ROWS):
    """
    pred:     [B, 1, H, W] logits. Any float dtype; bf16 recommended (halves HBM traffic).
    mask:     [B, 1, H, W] values in {0, 1}. int8/uint8 recommended; bool/float accepted.
    pred_iou: [B, 1]
    Returns a scalar matching FocalDiceloss_IoULoss.forward.
    """
    assert pred.shape == mask.shape, "pred and mask should have the same shape."
    sums, numel = _reduce_sums(pred, mask, block_rows=block_rows,
                               small_rows=small_rows)
    sum_p, sum_m, sum_pm, sum_focal = sums[0], sums[1], sums[2], sums[3]

    # FocalLoss
    num_pos = sum_m
    num_neg = jnp.float32(numel) - num_pos
    focal_loss = sum_focal / (num_pos + num_neg + 1e-12)

    # DiceLoss
    dice = (2.0 * sum_pm + SMOOTH) / (sum_p + sum_m + SMOOTH)
    dice_loss = 1.0 - dice

    loss1 = weight * focal_loss + dice_loss

    # MaskIoULoss
    intersection = sum_pm
    union = sum_p + sum_m - intersection
    iou = (intersection + 1e-07) / (union + 1e-07)
    iou_loss = jnp.mean((iou - pred_iou.astype(jnp.float32)) ** 2)

    return loss1 + iou_loss * iou_scale


def _reference_loss(pred, mask, pred_iou, weight=WEIGHT, iou_scale=IOU_SCALE):
    """Pure-JAX reference mirroring the PyTorch module, for validation."""
    p = jax.nn.sigmoid(pred.astype(jnp.float32))
    m = mask.astype(jnp.float32)
    num_pos = jnp.sum(m)
    num_neg = m.size - num_pos
    w_pos = (1.0 - p) ** GAMMA
    w_neg = p ** GAMMA
    loss_pos = -ALPHA * m * w_pos * jnp.log(p + 1e-12)
    loss_neg = -(1.0 - ALPHA) * (1.0 - m) * w_neg * jnp.log(1.0 - p + 1e-12)
    focal = (jnp.sum(loss_pos) + jnp.sum(loss_neg)) / (num_pos + num_neg + 1e-12)
    inter = jnp.sum(p * m)
    union = jnp.sum(p) + jnp.sum(m)
    dice_loss = 1.0 - (2.0 * inter + SMOOTH) / (union + SMOOTH)
    loss1 = weight * focal + dice_loss
    union_iou = jnp.sum(p) + jnp.sum(m) - inter
    iou = (inter + 1e-07) / (union_iou + 1e-07)
    iou_loss = jnp.mean((iou - pred_iou.astype(jnp.float32)) ** 2)
    return loss1 + iou_loss * iou_scale


if __name__ == "__main__":
    key = jax.random.PRNGKey(0)
    k1, k2, k3 = jax.random.split(key, 3)
    RTOL = ATOL = 5e-3   # approx EUP reciprocal (~2^-12 rel err) -> relaxed tol

    # --- Check 1: f32 inputs, module-spec shapes [B,1,H,W] / [B,1] ----------
    B, C, H, W = 2, 1, 16, 16
    pred = jax.random.normal(k1, (B, C, H, W), dtype=jnp.float32) * 2.0
    mask = (jax.random.uniform(k2, (B, C, H, W)) > 0.5).astype(jnp.float32)
    pred_iou = jax.random.uniform(k3, (B, 1), dtype=jnp.float32)
    out = jax.block_until_ready(focal_dice_iou_loss(pred, mask, pred_iou))
    ref = jax.block_until_ready(_reference_loss(pred, mask, pred_iou))
    assert jnp.allclose(out, ref, rtol=RTOL, atol=ATOL), (out, ref)

    # --- Check 2: narrow-dtype contract (bf16 logits + int8 mask) -----------
    pred2 = (jax.random.normal(k1, (2, 1, 32, 32), dtype=jnp.float32) * 2.0
             ).astype(jnp.bfloat16)
    mask2 = (jax.random.uniform(k2, (2, 1, 32, 32)) > 0.5).astype(jnp.int8)
    iou2 = jax.random.uniform(k3, (2, 1), dtype=jnp.float32)
    out2 = jax.block_until_ready(focal_dice_iou_loss(pred2, mask2, iou2))
    ref2 = jax.block_until_ready(_reference_loss(pred2, mask2, iou2))
    assert jnp.allclose(out2, ref2, rtol=RTOL, atol=ATOL), (out2, ref2)

    # --- Check 3: multi-block grid with ragged last block (masked path) -----
    pred3 = jax.random.normal(k1, (1, 1, 12, 128), dtype=jnp.float32)
    # include an extreme negative logit: exercises the stable-softplus fix
    pred3 = pred3.at[0, 0, 0, 0].set(-120.0)
    mask3 = (jax.random.uniform(k2, (1, 1, 12, 128)) > 0.5).astype(jnp.float32)
    iou3 = jax.random.uniform(k3, (1, 1), dtype=jnp.float32)
    out3 = jax.block_until_ready(
        focal_dice_iou_loss(pred3, mask3, iou3, block_rows=8, small_rows=8))
    ref3 = jax.block_until_ready(_reference_loss(pred3, mask3, iou3))
    assert jnp.isfinite(out3), out3
    assert jnp.allclose(out3, ref3, rtol=RTOL, atol=ATOL), (out3, ref3)

    # --- Check 4: numel not a multiple of 128 (minimal-pad fallback + mask) --
    pred4 = jax.random.normal(k1, (2, 1, 5, 7), dtype=jnp.float32)
    mask4 = (jax.random.uniform(k2, (2, 1, 5, 7)) > 0.5).astype(jnp.float32)
    iou4 = jax.random.uniform(k3, (2, 1), dtype=jnp.float32)
    out4 = jax.block_until_ready(focal_dice_iou_loss(pred4, mask4, iou4))
    ref4 = jax.block_until_ready(_reference_loss(pred4, mask4, iou4))
    assert jnp.allclose(out4, ref4, rtol=RTOL, atol=ATOL), (out4, ref4)

    print("KERNEL_OK")
</pallas_src>

<mosaic_0001>
module attributes {stable_mosaic.version = 11 : i64} {
  func.func @kernel(%arg0: i32, %arg1: memref<4x128xf32, #tpu.memory_space<vmem>>, %arg2: memref<4x128xf32, #tpu.memory_space<vmem>>, %arg3: memref<1x4x8x128xf32, #tpu.memory_space<vmem>>) attributes {dimension_semantics = [#tpu.dimension_semantics<parallel>], iteration_bounds = array<i64: 1>, scalar_prefetch = 0 : i64, scratch_operands = 0 : i64, tpu.core_type = #tpu.core_type<tc>, window_params = [{transform_indices = @transform_0, window_bounds = array<i64: 4, 128>}, {transform_indices = @transform_1, window_bounds = array<i64: 4, 128>}, {transform_indices = @transform_2, window_bounds = array<i64: 1, 4, 8, 128>}]} {
    %cst = arith.constant 0.000000e+00 : f32
    %0 = vector.broadcast %cst : f32 to vector<8x128xf32>
    %c0_i32 = arith.constant 0 : i32
    %c4_i32 = arith.constant 4 : i32
    %1 = arith.muli %c0_i32, %c4_i32 : i32
    %2 = arith.index_cast %1 : i32 to index
    %c0 = arith.constant 0 : index
    %3 = vector.load %arg1[%2, %c0] : memref<4x128xf32, #tpu.memory_space<vmem>>, vector<4x128xf32>
    %4 = arith.index_cast %1 : i32 to index
    %c0_0 = arith.constant 0 : index
    %5 = vector.load %arg2[%4, %c0_0] : memref<4x128xf32, #tpu.memory_space<vmem>>, vector<4x128xf32>
    %6 = math.absf %3 : vector<4x128xf32>
    %cst_1 = arith.constant 0.000000e+00 : f32
    %7 = vector.broadcast %cst_1 : f32 to vector<4x128xf32>
    %8 = arith.subf %7, %6 : vector<4x128xf32>
    %9 = math.exp %8 : vector<4x128xf32>
    %10 = math.log1p %9 : vector<4x128xf32>
    %cst_2 = arith.constant 0.000000e+00 : f32
    %11 = vector.broadcast %cst_2 : f32 to vector<4x128xf32>
    %12 = arith.maximumf %3, %11 : vector<4x128xf32>
    %13 = arith.addf %12, %10 : vector<4x128xf32>
    %cst_3 = arith.constant 0.000000e+00 : f32
    %14 = vector.broadcast %cst_3 : f32 to vector<4x128xf32>
    %15 = arith.subf %14, %3 : vector<4x128xf32>
    %cst_4 = arith.constant 0.000000e+00 : f32
    %16 = vector.broadcast %cst_4 : f32 to vector<4x128xf32>
    %17 = arith.maximumf %15, %16 : vector<4x128xf32>
    %18 = arith.addf %17, %10 : vector<4x128xf32>
    %cst_5 = arith.constant 1.000000e+00 : f32
    %19 = vector.broadcast %cst_5 : f32 to vector<4x128xf32>
    %20 = arith.addf %19, %9 : vector<4x128xf32>
    %21 = tpu.reciprocal %20 {approx = true} : vector<4x128xf32> -> vector<4x128xf32>
    %22 = arith.mulf %9, %21 : vector<4x128xf32>
    %cst_6 = arith.constant 0.000000e+00 : f32
    %23 = vector.broadcast %cst_6 : f32 to vector<4x128xf32>
    %24 = arith.cmpf oge, %3, %23 : vector<4x128xf32>
    %25 = arith.select %24, %21, %22 : vector<4x128xi1>, vector<4x128xf32>
    %26 = arith.select %24, %22, %21 : vector<4x128xi1>, vector<4x128xf32>
    %cst_7 = arith.constant 2.500000e-01 : f32
    %27 = vector.broadcast %cst_7 : f32 to vector<4x128xf32>
    %28 = arith.mulf %27, %5 : vector<4x128xf32>
    %29 = arith.mulf %26, %26 : vector<4x128xf32>
    %30 = arith.mulf %28, %29 : vector<4x128xf32>
    %31 = arith.mulf %30, %18 : vector<4x128xf32>
    %cst_8 = arith.constant 1.000000e+00 : f32
    %32 = vector.broadcast %cst_8 : f32 to vector<4x128xf32>
    %33 = arith.subf %32, %5 : vector<4x128xf32>
    %cst_9 = arith.constant 7.500000e-01 : f32
    %34 = vector.broadcast %cst_9 : f32 to vector<4x128xf32>
    %35 = arith.mulf %34, %33 : vector<4x128xf32>
    %36 = arith.mulf %25, %25 : vector<4x128xf32>
    %37 = arith.mulf %35, %36 : vector<4x128xf32>
    %38 = arith.mulf %37, %13 : vector<4x128xf32>
    %39 = arith.addf %31, %38 : vector<4x128xf32>
    %40 = arith.mulf %25, %5 : vector<4x128xf32>
    %cst_10 = arith.constant dense<0.000000e+00> : vector<128xf32>
    %41 = vector.multi_reduction <add>, %25, %cst_10 [0] : vector<4x128xf32> to vector<128xf32>
    %42 = vector.shape_cast %41 : vector<128xf32> to vector<1x128xf32>
    %43 = tpu.iota {dimensions = array<i32: 0>} : vector<8x128xi32>
    %c0_i32_11 = arith.constant 0 : i32
    %44 = vector.broadcast %c0_i32_11 : i32 to vector<8x128xi32>
    %45 = arith.cmpi eq, %43, %44 : vector<8x128xi32>
    %46 = vector.shape_cast %42 : vector<1x128xf32> to vector<1x128xf32>
    %47 = vector.broadcast %46 : vector<1x128xf32> to vector<8x128xf32>
    %cst_12 = arith.constant 0.000000e+00 : f32
    %48 = vector.broadcast %cst_12 : f32 to vector<8x128xf32>
    %49 = arith.select %45, %47, %48 : vector<8x128xi1>, vector<8x128xf32>
    %50 = arith.addf %0, %49 : vector<8x128xf32>
    %cst_13 = arith.constant dense<0.000000e+00> : vector<128xf32>
    %51 = vector.multi_reduction <add>, %5, %cst_13 [0] : vector<4x128xf32> to vector<128xf32>
    %52 = vector.shape_cast %51 : vector<128xf32> to vector<1x128xf32>
    %53 = tpu.iota {dimensions = array<i32: 0>} : vector<8x128xi32>
    %c0_i32_14 = arith.constant 0 : i32
    %54 = vector.broadcast %c0_i32_14 : i32 to vector<8x128xi32>
    %55 = arith.cmpi eq, %53, %54 : vector<8x128xi32>
    %56 = vector.shape_cast %52 : vector<1x128xf32> to vector<1x128xf32>
    %57 = vector.broadcast %56 : vector<1x128xf32> to vector<8x128xf32>
    %cst_15 = arith.constant 0.000000e+00 : f32
    %58 = vector.broadcast %cst_15 : f32 to vector<8x128xf32>
    %59 = arith.select %55, %57, %58 : vector<8x128xi1>, vector<8x128xf32>
    %60 = arith.addf %0, %59 : vector<8x128xf32>
    %cst_16 = arith.constant dense<0.000000e+00> : vector<128xf32>
    %61 = vector.multi_reduction <add>, %40, %cst_16 [0] : vector<4x128xf32> to vector<128xf32>
    %62 = vector.shape_cast %61 : vector<128xf32> to vector<1x128xf32>
    %63 = tpu.iota {dimensions = array<i32: 0>} : vector<8x128xi32>
    %c0_i32_17 = arith.constant 0 : i32
    %64 = vector.broadcast %c0_i32_17 : i32 to vector<8x128xi32>
    %65 = arith.cmpi eq, %63, %64 : vector<8x128xi32>
    %66 = vector.shape_cast %62 : vector<1x128xf32> to vector<1x128xf32>
    %67 = vector.broadcast %66 : vector<1x128xf32> to vector<8x128xf32>
    %cst_18 = arith.constant 0.000000e+00 : f32
    %68 = vector.broadcast %cst_18 : f32 to vector<8x128xf32>
    %69 = arith.select %65, %67, %68 : vector<8x128xi1>, vector<8x128xf32>
    %70 = arith.addf %0, %69 : vector<8x128xf32>
    %cst_19 = arith.constant dense<0.000000e+00> : vector<128xf32>
    %71 = vector.multi_reduction <add>, %39, %cst_19 [0] : vector<4x128xf32> to vector<128xf32>
    %72 = vector.shape_cast %71 : vector<128xf32> to vector<1x128xf32>
    %73 = tpu.iota {dimensions = array<i32: 0>} : vector<8x128xi32>
    %c0_i32_20 = arith.constant 0 : i32
    %74 = vector.broadcast %c0_i32_20 : i32 to vector<8x128xi32>
    %75 = arith.cmpi eq, %73, %74 : vector<8x128xi32>
    %76 = vector.shape_cast %72 : vector<1x128xf32> to vector<1x128xf32>
    %77 = vector.broadcast %76 : vector<1x128xf32> to vector<8x128xf32>
    %cst_21 = arith.constant 0.000000e+00 : f32
    %78 = vector.broadcast %cst_21 : f32 to vector<8x128xf32>
    %79 = arith.select %75, %77, %78 : vector<8x128xi1>, vector<8x128xf32>
    %80 = arith.addf %0, %79 : vector<8x128xf32>
    %c1_i32 = arith.constant 1 : i32
    %c0_22 = arith.constant 0 : index
    %c0_23 = arith.constant 0 : index
    %c0_24 = arith.constant 0 : index
    %c0_25 = arith.constant 0 : index
    %81 = vector.load %arg3[%c0_22, %c0_23, %c0_24, %c0_25] : memref<1x4x8x128xf32, #tpu.memory_space<vmem>>, vector<1x1x8x128xf32>
    %82 = vector.shape_cast %81 : vector<1x1x8x128xf32> to vector<8x128xf32>
    %83 = vector.shape_cast %50 : vector<8x128xf32> to vector<1x1x8x128xf32>
    tpu.vector_store %arg3[%c0_22, %c0_23, %c0_24, %c0_25], %83 {strides = array<i32>} : memref<1x4x8x128xf32, #tpu.memory_space<vmem>>, vector<1x1x8x128xf32>,
    %c0_26 = arith.constant 0 : index
    %c1 = arith.constant 1 : index
    %c0_27 = arith.constant 0 : index
    %c0_28 = arith.constant 0 : index
    %84 = vector.load %arg3[%c0_26, %c1, %c0_27, %c0_28] : memref<1x4x8x128xf32, #tpu.memory_space<vmem>>, vector<1x1x8x128xf32>
    %85 = vector.shape_cast %84 : vector<1x1x8x128xf32> to vector<8x128xf32>
    %86 = vector.shape_cast %60 : vector<8x128xf32> to vector<1x1x8x128xf32>
    tpu.vector_store %arg3[%c0_26, %c1, %c0_27, %c0_28], %86 {strides = array<i32>} : memref<1x4x8x128xf32, #tpu.memory_space<vmem>>, vector<1x1x8x128xf32>,
    %c0_29 = arith.constant 0 : index
    %c2 = arith.constant 2 : index
    %c0_30 = arith.constant 0 : index
    %c0_31 = arith.constant 0 : index
    %87 = vector.load %arg3[%c0_29, %c2, %c0_30, %c0_31] : memref<1x4x8x128xf32, #tpu.memory_space<vmem>>, vector<1x1x8x128xf32>
    %88 = vector.shape_cast %87 : vector<1x1x8x128xf32> to vector<8x128xf32>
    %89 = vector.shape_cast %70 : vector<8x128xf32> to vector<1x1x8x128xf32>
    tpu.vector_store %arg3[%c0_29, %c2, %c0_30, %c0_31], %89 {strides = array<i32>} : memref<1x4x8x128xf32, #tpu.memory_space<vmem>>, vector<1x1x8x128xf32>,
    %c0_32 = arith.constant 0 : index
    %c3 = arith.constant 3 : index
    %c0_33 = arith.constant 0 : index
    %c0_34 = arith.constant 0 : index
    %90 = vector.load %arg3[%c0_32, %c3, %c0_33, %c0_34] : memref<1x4x8x128xf32, #tpu.memory_space<vmem>>, vector<1x1x8x128xf32>
    %91 = vector.shape_cast %90 : vector<1x1x8x128xf32> to vector<8x128xf32>
    %92 = vector.shape_cast %80 : vector<8x128xf32> to vector<1x1x8x128xf32>
    tpu.vector_store %arg3[%c0_32, %c3, %c0_33, %c0_34], %92 {strides = array<i32>} : memref<1x4x8x128xf32, #tpu.memory_space<vmem>>, vector<1x1x8x128xf32>,
    return
  }
  func.func @transform_0(%arg0: i32) -> (i32, i32) {
    %c0_i32 = arith.constant 0 : i32
    %c0_i32_0 = arith.constant 0 : i32
    return %arg0, %c0_i32 : i32, i32
  }
  func.func @transform_1(%arg0: i32) -> (i32, i32) {
    %c0_i32 = arith.constant 0 : i32
    %c0_i32_0 = arith.constant 0 : i32
    return %arg0, %c0_i32 : i32, i32
  }
  func.func @transform_2(%arg0: i32) -> (i32, i32, i32, i32) {
    %c0_i32 = arith.constant 0 : i32
    %c0_i32_0 = arith.constant 0 : i32
    %c0_i32_1 = arith.constant 0 : i32
    %c0_i32_2 = arith.constant 0 : i32
    return %arg0, %c0_i32, %c0_i32_0, %c0_i32_1 : i32, i32, i32, i32
  }
}

</mosaic_0001>

<bundles_post_ra>
// kernel: tpu_custom_call.1
= control target key start
LH: loop header
LB: loop body
LE: loop exit
PB: predicated region body
PF: predicated region fallthrough
CT: control target
= control target key end

     0   :  { %7 = vsyncpa [#allocation3], 0  ;;  %s292_s0 = inlined_call_operand.hbm [shape: f32[4,128], index: 0, kind: input, shape index: {}]   ;;  %s293_s1 = inlined_call_operand.hbm [shape: f32[4,128], index: 1, kind: input, shape index: {}]   ;;  %s294_s2 = inlined_call_operand.hbm [shape: f32[1,4,8,128], index: 2, kind: output, shape index: {}]  }
   0x1   :  { %8 = vsyncpa [#allocation6], 0 }
   0x2   :  { %9 = vsyncpa [#allocation4], 0  ;;  %s221_s9 = smov [#allocation2]   ;;  %s222_s11 = smov [#allocation5]  }
   0x3   :  { %s16_s10 = sshll.u32 %s221_s9, 4  ;;  %s26_s12 = sshll.u32 %s222_s11, 4  ;;  %s17_s10 = int_to_ptr.vmem [resolvable:$true] %s16_s10  ;;  %s27_s12 = int_to_ptr.vmem [resolvable:$true] %s26_s12 }
   0x4   :  { %s149_s15 = scalar_lea.hbm %s292_s0, 64 }
   0x5   :  { %p150_p0 = scmp.ne.s32.totalorder %s292_s0, %s149_s15  ;;  %p153_p1 = scmp.lt.u32.totalorder %s149_s15, %s292_s0 }
   0x7   :  { %p155_p2 = pnand %p153_p1, %p150_p0 }
   0x9   :  { %158 = shalt.err (!%p155_p2)
}
   0xa   :  { %s159_s20 = scalar_lea.vmem %s17_s10, 64  ;;  %p164_p4 = scmp.lt.s32.totalorder %s17_s10, %s17_s10 }
   0xb   :  { %p160_p3 = scmp.ne.s32.totalorder %s17_s10, %s159_s20  ;;  %p165_p5 = scmp.lt.s32.totalorder %s159_s20, %s159_s20 }
   0xd   :  { %p166_p6 = por %p165_p5, %p164_p4 }
   0xf   :  { %p167_p7 = pnand %p166_p6, %p160_p3 }
  0x11   :  { %170 = shalt.err (!%p167_p7)
}
  0x12   :  { %19 = dma.hbm_to_vmem [thread:$0]  %s292_s0, 64, %s17_s10, [#allocation3]  }
  0x13   :  { %s171_s25 = scalar_lea.hbm %s293_s1, 64 }
  0x14   :  { %p172_p8 = scmp.ne.s32.totalorder %s293_s1, %s171_s25  ;;  %p175_p9 = scmp.lt.u32.totalorder %s171_s25, %s293_s1 }
  0x16   :  { %p177_p10 = pnand %p175_p9, %p172_p8 }
  0x18   :  { %180 = shalt.err (!%p177_p10)
}
  0x19   :  { %s181_s30 = scalar_lea.vmem %s27_s12, 64  ;;  %p186_p12 = scmp.lt.s32.totalorder %s27_s12, %s27_s12 }
  0x1a   :  { %p182_p11 = scmp.ne.s32.totalorder %s27_s12, %s181_s30  ;;  %p187_p13 = scmp.lt.s32.totalorder %s181_s30, %s181_s30 }
  0x1c   :  { %p188_p0 = por %p187_p13, %p186_p12 }
  0x1e   :  { %p189_p1 = pnand %p188_p0, %p182_p11 }
  0x20   :  { %192 = shalt.err (!%p189_p1)
}
  0x21   :  { %29 = dma.hbm_to_vmem [thread:$0]  %s293_s1, 64, %s27_s12, [#allocation6]  }
  0x22   :  { %215 = dma.done.wait [#allocation3], 64  }
  0x23   :  { %216 = vsyncadd [#allocation3], 4294967232 }
  0x24   :  { %217 = dma.done.wait [#allocation6], 64  }
  0x25   :  { %218 = vsyncadd [#allocation6], 4294967232  ;;  %vm73_vm0 = vcmask 1043456   ;;  %v36_v0 = vld [vmem:[#allocation2] sm:$0xf]  ;;  %v81_v6 = vlaneseq  ;;  %s223_s1 = smov [#allocation7]  }
  0x26   :  { %v37_v1 = vld [vmem:[#allocation5] sm:$0xf]  ;;  %v38_v2 = vand.u32 2147483647, %v36_v0  ;;  %v53_v20 = vsub.f32 0.0, %v36_v0  ;;  %vm59_vm2 = vcmp.ge.f32.partialorder %v36_v0, 0.0 }
  0x27   :  { %v86_v3 = vsel %vm73_vm0, %v37_v1, 0.0  ;;  %v266_v10 = vshrl.u32 %v81_v6, 7  ;;  %v66_v21 = vsub.f32 1.0, %v37_v1  ;;  %v51_v26 = vmax.f32 %v36_v0, 0.0  ;;  %s125_s4 = sshll.u32 %s223_s1, 4  ;;  %s126_s4 = int_to_ptr.vmem [resolvable:$true] %s125_s4 }
  0x28   :  { %v87_v4 = vrot.slane %v86_v3, 4  ;;  %v39_v5 = vsub.f32 0.0, %v38_v2  ;;  %v54_v28 = vmax.f32 %v53_v20, 0.0  ;;  %v62_v29 = vmul.f32 0.25, %v37_v1  ;;  %s193_s5 = scalar_lea.vmem %s126_s4, 512  ;;  %p198_p3 = scmp.lt.s32.totalorder %s126_s4, %s126_s4 }
  0x29   :  { %vm83_vm1 = vcmp.eq.s32.totalorder %v266_v10, 0  ;;  %v67_v32 = vmul.f32 0.75, %v66_v21  ;;  %p194_p2 = scmp.ne.s32.totalorder %s126_s4, %s193_s5  ;;  %p199_p4 = scmp.lt.s32.totalorder %s193_s5, %s193_s5 }
  0x2a   :  { %v88_v7 = vadd.f32 %v87_v4, %v86_v3  ;;  %v40_v8 = vmul.f32 1.442695, %v39_v5 }
  0x2b   :  { %p200_p5 = por %p199_p4, %p198_p3 }
  0x2c   :  { %v89_v9 = vrot.slane %v88_v7, 2  ;;  %143 = vpow2.f32 %v40_v8 }
  0x2d   :  { %p201_p6 = pnand %p200_p5, %p194_p2 }
  0x2e   :  { %v90_v11 = vadd.f32 %v89_v9, %v88_v7 }
  0x30   :  { %v91_v12 = vrot.slane %v90_v11, 1 }
  0x32   :  { %v92_v13 = vadd.f32 %v91_v12, %v90_v11 }
  0x34   :  { %v93_v14 = vsel %vm83_vm1, %v92_v13, 0.0 }
  0x35   :  { %115 = vst [vmem:[#allocation7 + $0x8] sm:$0xff] %v93_v14 }
  0x36   :  { %v144_v15 = vpop.eup %143 }
  0x37   :  { %v42_v16 = vadd.f32 1.0, %v144_v15  ;;  %v45_v17 = vmul.f32 -0.5, %v144_v15  ;;  %v48_v19 = vand.u32 2147483647, %v144_v15 }
  0x39   :  { %145 = vrcp.f32 %v42_v16  ;;  %v46_v18 = vadd.f32 1.0, %v45_v17  ;;  %vm49_vm3 = vcmp.lt.f32.partialorder %v48_v19, 0.0004427343 }
  0x3a   :  { %147 = vlog2.f32 %v42_v16 }
  0x3b   :  { %v47_v25 = vmul.f32 %v144_v15, %v46_v18 }
  0x43   :  { %v146_v22 = vpop.eup %145 }
  0x44   :  { %v148_v23 = vpop.eup %147  ;;  %v58_v24 = vmul.f32 %v146_v22, %v144_v15 }
  0x45   :  { %v44_v27 = vmul.f32 0.6931472, %v148_v23 }
  0x46   :  { %v60_v30 = vsel %vm59_vm2, %v146_v22, %v58_v24  ;;  %v61_v31 = vsel %vm59_vm2, %v58_v24, %v146_v22 }
  0x47   :  { %v63_v33 = vmul.f32 %v61_v31, %v61_v31  ;;  %v68_v34 = vmul.f32 %v60_v30, %v60_v30  ;;  %v74_v35 = vsel %vm73_vm0, %v60_v30, 0.0  ;;  %v72_v36 = vmul.f32 %v60_v30, %v37_v1 }
  0x48   :  { %v75_v37 = vrot.slane %v74_v35, 4  ;;  %v50_v38 = vsel %vm49_vm3, %v47_v25, %v44_v27 }
  0x49   :  { %v95_v39 = vsel %vm73_vm0, %v72_v36, 0.0  ;;  %v52_v40 = vadd.f32 %v51_v26, %v50_v38  ;;  %v55_v41 = vadd.f32 %v54_v28, %v50_v38  ;;  %v64_v42 = vmul.f32 %v63_v33, %v62_v29 }
  0x4a   :  { %v76_v43 = vadd.f32 %v75_v37, %v74_v35  ;;  %v96_v44 = vrot.slane %v95_v39, 4  ;;  %v69_v45 = vmul.f32 %v68_v34, %v67_v32 }
  0x4b   :  { %v65_v46 = vmul.f32 %v64_v42, %v55_v41 }
  0x4c   :  { %v77_v47 = vrot.slane %v76_v43, 2  ;;  %v97_v48 = vadd.f32 %v96_v44, %v95_v39  ;;  %v70_v49 = vmul.f32 %v69_v45, %v52_v40 }
  0x4e   :  { %v78_v50 = vadd.f32 %v77_v47, %v76_v43  ;;  %v98_v51 = vrot.slane %v97_v48, 2  ;;  %v71_v52 = vadd.f32 %v70_v49, %v65_v46 }
  0x50   :  { %v79_v53 = vrot.slane %v78_v50, 1  ;;  %v99_v54 = vadd.f32 %v98_v51, %v97_v48  ;;  %v104_v55 = vsel %vm73_vm0, %v71_v52, 0.0 }
  0x51   :  { %v105_v56 = vrot.slane %v104_v55, 4 }
  0x52   :  { %v80_v57 = vadd.f32 %v79_v53, %v78_v50  ;;  %v100_v58 = vrot.slane %v99_v54, 1 }
  0x53   :  { %v106_v59 = vadd.f32 %v105_v56, %v104_v55 }
  0x54   :  { %v84_v60 = vsel %vm83_vm1, %v80_v57, 0.0  ;;  %v101_v61 = vadd.f32 %v100_v58, %v99_v54 }
  0x55   :  { %113 = vst [vmem:[#allocation7] sm:$0xff] %v84_v60  ;;  %v107_v62 = vrot.slane %v106_v59, 2 }
  0x56   :  { %v102_v63 = vsel %vm83_vm1, %v101_v61, 0.0 }
  0x57   :  { %117 = vst [vmem:[#allocation7 + $0x10] sm:$0xff] %v102_v63  ;;  %v108_v0 = vadd.f32 %v107_v62, %v106_v59 }
  0x59   :  { %v109_v1 = vrot.slane %v108_v0, 1 }
  0x5b   :  { %v110_v2 = vadd.f32 %v109_v1, %v108_v0 }
  0x5d   :  { %v111_v3 = vsel %vm83_vm1, %v110_v2, 0.0 }
  0x5e   :  { %119 = vst [vmem:[#allocation7 + $0x18] sm:$0xff] %v111_v3 }
  0x5f   :  { %204 = shalt.err (!%p201_p6)
}
  0x60   :  { %s205_s8 = scalar_lea.hbm %s294_s2, 512 }
  0x61   :  { %p206_p7 = scmp.ne.s32.totalorder %s294_s2, %s205_s8  ;;  %p209_p8 = scmp.lt.u32.totalorder %s205_s8, %s294_s2 }
  0x63   :  { %p211_p9 = pnand %p209_p8, %p206_p7 }
  0x65   :  { %214 = shalt.err (!%p211_p9)
}
  0x66   :  { %s224_s13 = smov 128   ;;  %s225_s14 = smov 8  }
  0x67   :  { %131 = dma.vmem_to_hbm [thread:$0]  %s126_s4, 512, %s294_s2, [#allocation4], %s224_s13, %s224_s13, %s225_s14  }
  0x68   :  { %219 = dma.done.wait [#allocation4], 512  }
  0x69   :  { %220 = vsyncadd [#allocation4], 4294966784 }
  0x6a   :  { %135 = vsyncpa [#allocation3], 1 }
  0x6b   :  { %136 = vsyncpa [#allocation6], 1 }
  0x6c   :  { %137 = vsyncpa [#allocation4], 1 }

</bundles_post_ra>
